<compile_context>
chip_gen: v7x
topology: tpu7x:2x2x1
jax: 0.10.0
libtpu: 0.0.40
codegen_flags: <defaults>
</compile_context>

<pallas_src>
import math
import functools

import jax
import jax.numpy as jnp
from jax.experimental import pallas as pl
from jax.experimental.pallas import tpu as pltpu


def _round_up(x, m):
    return ((x + m - 1) // m) * m


def _sublane_align(dtype):
    # f32 -> 8, bf16/f16 -> 16, int8/fp8 -> 32 (packed-sublane layouts).
    isz = jnp.dtype(dtype).itemsize
    return 8 * max(1, 4 // max(1, isz))


def _vmem_info():
    """Returns (vmem_capacity_bytes, is_small_vmem_part)."""
    try:
        cap = int(pltpu.get_tpu_info().vmem_capacity_bytes)
    except Exception:
        cap = 64 << 20  # conservative (v7x-sized) fallback
    return cap, cap < (100 << 20)


def _pick_tile(dim_padded, cap, aligns):
    """Largest tile <= cap that divides dim_padded, preferring earlier aligns.
    Falls back to an aligned cap (=> padding) only if no divisor exists."""
    for a in aligns:
        if dim_padded % a:
            continue
        c = max(a, (min(cap, dim_padded) // a) * a)
        if dim_padded <= c:
            return dim_padded
        t = c
        while t >= a:
            if dim_padded % t == 0:
                return t
            t -= a
    a = aligns[-1]
    return max(a, (min(cap, _round_up(dim_padded, a)) // a) * a)


def _apply_activation(y, activation):
    # bias_act semantics with default gains baked in.
    if activation == "linear":
        return y
    if activation == "relu":
        return jnp.maximum(y, 0.0) * math.sqrt(2.0)
    if activation == "lrelu":
        return jnp.where(y >= 0.0, y, 0.2 * y) * math.sqrt(2.0)
    if activation == "tanh":
        return jnp.tanh(y)
    if activation == "sigmoid":
        return jax.nn.sigmoid(y)
    # TODO(synk): remaining bias_act activations (elu/selu/softplus/swish) not wired up.
    raise NotImplementedError(activation)


# ---------------------------------------------------------------------------
# Kernels
# ---------------------------------------------------------------------------

def _fc_kernel_single_k(x_ref, wt_ref, *rest, weight_gain, bias_gain,
                        activation, has_bias):
    # K fits in one tile: no reduction axis, no f32 scratch, single store.
    if has_bias:
        b_ref, o_ref = rest
    else:
        (o_ref,) = rest
    y = jnp.dot(x_ref[...], wt_ref[...], preferred_element_type=jnp.float32)
    y = y * weight_gain
    if has_bias:
        y = y + b_ref[...].astype(jnp.float32) * bias_gain
    o_ref[...] = _apply_activation(y, activation).astype(o_ref.dtype)


def _fc_kernel_multi_k(x_ref, wt_ref, *rest, weight_gain, bias_gain,
                       activation, has_bias):
    if has_bias:
        b_ref, o_ref, acc_ref = rest
    else:
        o_ref, acc_ref = rest

    k = pl.program_id(2)
    prod = jnp.dot(x_ref[...], wt_ref[...], preferred_element_type=jnp.float32)

    @pl.when(k == 0)
    def _():
        acc_ref[...] = prod          # direct write: no zero-init pass

    @pl.when(k > 0)
    def _():
        acc_ref[...] += prod

    @pl.when(k == pl.num_programs(2) - 1)
    def _():
        y = acc_ref[...] * weight_gain
        if has_bias:
            y = y + b_ref[...].astype(jnp.float32) * bias_gain
        o_ref[...] = _apply_activation(y, activation).astype(o_ref.dtype)


# ---------------------------------------------------------------------------
# Wrapper
# ---------------------------------------------------------------------------

def prepare_fc_weight(weight, dtype):
    """One-time weight prep (hoist out of the per-forward path):
    [out_features, in_features] -> [in_features, out_features] in `dtype`."""
    return jnp.swapaxes(weight, 0, 1).astype(dtype)


def fully_connected(x, weight, bias=None, *, activation="linear",
                    lr_multiplier=1.0, weight_is_transposed=False,
                    tm=None, tn=None, tk=None):
    """Pallas TPU implementation of FullyConnectedLayer.forward.

    x: [..., in_features]
    weight: [out_features, in_features], or [in_features, out_features] if
            weight_is_transposed=True (use prepare_fc_weight to cache it).
    """
    orig_shape = x.shape
    if x.ndim != 2:
        x = x.reshape(-1, orig_shape[-1])
    M, K = x.shape

    if weight_is_transposed:
        K2, N = weight.shape
        wt = weight if weight.dtype == x.dtype else weight.astype(x.dtype)
    else:
        N, K2 = weight.shape
        wt = jnp.swapaxes(weight, 0, 1).astype(x.dtype)
    assert K == K2, (K, K2)

    weight_gain = float(lr_multiplier) / math.sqrt(K)
    bias_gain = float(lr_multiplier)
    has_bias = bias is not None

    out_dtype = x.dtype
    in_bytes = jnp.dtype(x.dtype).itemsize
    out_bytes = jnp.dtype(out_dtype).itemsize
    sub = _sublane_align(x.dtype)

    vmem_cap, small_vmem = _vmem_info()
    # ~55% of physical VMEM for tiles (<= ~96 MiB on 128-MiB v5e/v6e,
    # ~35 MiB on 64-MiB v7x), leaving Mosaic headroom.
    vmem_budget = min(int(vmem_cap * 0.55), 96 << 20)

    # Minimum padded extents (sublane / lane alignment only).
    Mp0 = _round_up(M, sub)
    Np0 = _round_up(N, 128)
    Kp0 = _round_up(K, 128)

    # Generation-aware caps: 64-MiB parts (v7x) need less tm for the roofline
    # and have less VMEM; 128-MiB parts (v5e/v6e) want tm=512 / big tk.
    if small_vmem:
        cap_tm, cap_tn, cap_tk = 256, 512, 1024
    else:
        cap_tm, cap_tn, cap_tk = 512, 512, 2048

    tm = tm or _pick_tile(Mp0, cap_tm, (sub,))
    tn = tn or _pick_tile(Np0, cap_tn, (256, 128))
    tk = tk or _pick_tile(Kp0, cap_tk, (256, 128))

    def vmem_need(_tm, _tn, _tk, _single):
        b = 2 * (_tm * _tk + _tk * _tn) * in_bytes   # double-buffered x & w^T
        b += 2 * _tm * _tn * out_bytes               # double-buffered output
        if not _single:
            b += _tm * _tn * 4                       # f32 accumulator scratch
        if has_bias:
            b += 2 * _tn * in_bytes
        return b

    def _shrunk(t, dim_padded, aligns):
        a = aligns[-1]
        return _pick_tile(dim_padded, max(a, t // 2), aligns)

    # Shrink order tn -> tm -> tk: keep the K stride and tm large (v5e vst-slot
    # pressure and v6e weight-stream roofline both prefer it).
    while vmem_need(tm, tn, tk, tk >= Kp0) > vmem_budget and tn > 128:
        tn = _shrunk(tn, Np0, (256, 128))
    while vmem_need(tm, tn, tk, tk >= Kp0) > vmem_budget and tm > sub:
        tm = _shrunk(tm, Mp0, (sub,))
    while vmem_need(tm, tn, tk, tk >= Kp0) > vmem_budget and tk > 128:
        tk = _shrunk(tk, Kp0, (256, 128))

    # On 2-TC parts (v7x), make sure the parallel (i, j) extent is >= 2 so one
    # core doesn't idle on tiny problems.
    if small_vmem and (Mp0 // max(tm, 1)) * (Np0 // max(tn, 1)) <= 1:
        if Np0 // tn <= 1 and tn % 256 == 0:
            tn //= 2
        elif Mp0 // tm <= 1 and tm % (2 * sub) == 0:
            tm //= 2

    Mp, Np, Kp = _round_up(M, tm), _round_up(N, tn), _round_up(K, tk)
    single_k = (Kp == tk)

    # Pad only when truly ragged (divisor tiles keep this a no-op for aligned
    # shapes). Zero K-padding contributes nothing to the accumulation.
    x_p = x if (Mp == M and Kp == K) else jnp.pad(x, ((0, Mp - M), (0, Kp - K)))
    wt_p = wt if (Kp == K and Np == N) else jnp.pad(wt, ((0, Kp - K), (0, Np - N)))

    args = [x_p, wt_p]
    if single_k:
        in_specs = [
            pl.BlockSpec((tm, tk), lambda i, j: (i, 0)),   # x        [M, K]
            pl.BlockSpec((tk, tn), lambda i, j: (0, j)),   # weight^T [K, N]
        ]
        out_spec = pl.BlockSpec((tm, tn), lambda i, j: (i, j))
        bias_spec = pl.BlockSpec((1, tn), lambda i, j: (0, j))
        grid = (Mp // tm, Np // tn)
        dims = ("parallel", "parallel")
        scratch = []
        kernel_fn = _fc_kernel_single_k
    else:
        in_specs = [
            pl.BlockSpec((tm, tk), lambda i, j, k: (i, k)),
            pl.BlockSpec((tk, tn), lambda i, j, k: (k, j)),
        ]
        out_spec = pl.BlockSpec((tm, tn), lambda i, j, k: (i, j))
        bias_spec = pl.BlockSpec((1, tn), lambda i, j, k: (0, j))
        grid = (Mp // tm, Np // tn, Kp // tk)
        dims = ("parallel", "parallel", "arbitrary")
        scratch = [pltpu.VMEM((tm, tn), jnp.float32)]
        kernel_fn = _fc_kernel_multi_k

    if has_bias:
        b_p = bias.astype(x.dtype).reshape(1, N)
        if Np != N:
            b_p = jnp.pad(b_p, ((0, 0), (0, Np - N)))
        in_specs.append(bias_spec)
        args.append(b_p)

    kernel = functools.partial(
        kernel_fn,
        weight_gain=weight_gain,
        bias_gain=bias_gain,
        activation=activation,
        has_bias=has_bias,
    )

    need = vmem_need(tm, tn, tk, single_k)
    vmem_limit = int(min(max(need + (8 << 20), 32 << 20), int(vmem_cap * 0.65)))
    vmem_limit = max(vmem_limit, need + (2 << 20))

    bytes_accessed = (M * K + K * N) * in_bytes + M * N * out_bytes
    if has_bias:
        bytes_accessed += N * in_bytes
    cost = pl.CostEstimate(flops=2 * M * N * K, transcendentals=0,
                           bytes_accessed=bytes_accessed)

    out = pl.pallas_call(
        kernel,
        out_shape=jax.ShapeDtypeStruct((Mp, Np), out_dtype),
        grid_spec=pltpu.PrefetchScalarGridSpec(
            num_scalar_prefetch=0,
            grid=grid,
            in_specs=in_specs,
            out_specs=out_spec,
            scratch_shapes=scratch,
        ),
        compiler_params=pltpu.CompilerParams(
            dimension_semantics=dims,
            vmem_limit_bytes=vmem_limit),
        cost_estimate=cost,
    )(*args)

    if Mp != M or Np != N:
        out = out[:M, :N]
    if len(orig_shape) != 2:
        out = out.reshape(orig_shape[:-1] + (N,))
    return out


if __name__ == "__main__":
    # Module config (synthetic, deterministic init).
    in_features = 128
    out_features = 128
    batch = 16
    lr_multiplier = 0.5
    bias_init = 0.1

    key = jax.random.PRNGKey(0)
    kx, kw, kx2, kw2 = jax.random.split(key, 4)

    # torch.randn([out, in]) / lr_multiplier
    weight = jax.random.normal(kw, (out_features, in_features), jnp.float32) / lr_multiplier
    # torch.full([out], bias_init)
    bias = jnp.full((out_features,), jnp.float32(bias_init))
    x = jax.random.normal(kx, (batch, in_features), jnp.float32)

    w_ref = weight * (lr_multiplier / math.sqrt(in_features))
    b_ref = bias * lr_multiplier

    # Case 1: bias + linear (addmm path), weight pre-transposed once (hoisted).
    wt_cached = prepare_fc_weight(weight, x.dtype)
    y = fully_connected(x, wt_cached, bias, activation="linear",
                        lr_multiplier=lr_multiplier, weight_is_transposed=True)
    y = jax.block_until_ready(y)
    y_ref = x @ w_ref.T + b_ref[None, :]
    assert y.shape == (batch, out_features)
    assert jnp.allclose(y, y_ref, atol=1e-4, rtol=1e-4)

    # Case 2: no bias + lrelu (bias_act path), raw [N, K] weight.
    y2 = fully_connected(x, weight, None, activation="lrelu",
                         lr_multiplier=lr_multiplier)
    y2 = jax.block_until_ready(y2)
    t = x @ w_ref.T
    y2_ref = jnp.where(t >= 0.0, t, 0.2 * t) * math.sqrt(2.0)
    assert jnp.allclose(y2, y2_ref, atol=1e-4, rtol=1e-4)

    # Case 3: ragged shapes + forced small tk to exercise the multi-K
    # accumulation path (M=10 pads to 16, N=192 pads to 256, K=256 / tk=128).
    M3, K3, N3 = 10, 256, 192
    x3 = jax.random.normal(kx2, (M3, K3), jnp.float32)
    w3 = jax.random.normal(kw2, (N3, K3), jnp.float32)
    b3 = jnp.full((N3,), jnp.float32(0.25))
    y3 = fully_connected(x3, w3, b3, activation="relu",
                         lr_multiplier=1.0, tk=128)
    y3 = jax.block_until_ready(y3)
    t3 = x3 @ (w3 / math.sqrt(K3)).T + b3[None, :]
    y3_ref = jnp.maximum(t3, 0.0) * math.sqrt(2.0)
    assert y3.shape == (M3, N3)
    assert jnp.allclose(y3, y3_ref, atol=1e-4, rtol=1e-4)

    print("KERNEL_OK")
</pallas_src>

<mosaic_0001>
module attributes {stable_mosaic.version = 11 : i64} {
  func.func @_fc_kernel_single_k(%arg0: i32, %arg1: i32, %arg2: memref<8x128xf32, #tpu.memory_space<vmem>>, %arg3: memref<128x128xf32, #tpu.memory_space<vmem>>, %arg4: memref<1x128xf32, #tpu.memory_space<vmem>>, %arg5: memref<8x128xf32, #tpu.memory_space<vmem>>) attributes {dimension_semantics = [#tpu.dimension_semantics<parallel>, #tpu.dimension_semantics<parallel>], iteration_bounds = array<i64: 2, 1>, scalar_prefetch = 0 : i64, scratch_operands = 0 : i64, tpu.core_type = #tpu.core_type<tc>, window_params = [{transform_indices = @transform_0, window_bounds = array<i64: 8, 128>}, {transform_indices = @transform_1, window_bounds = array<i64: 128, 128>}, {transform_indices = @transform_2, window_bounds = array<i64: 1, 128>}, {transform_indices = @transform_3, window_bounds = array<i64: 8, 128>}]} {
    %c0 = arith.constant 0 : index
    %c0_0 = arith.constant 0 : index
    %0 = vector.load %arg2[%c0, %c0_0] : memref<8x128xf32, #tpu.memory_space<vmem>>, vector<8x128xf32>
    %c0_1 = arith.constant 0 : index
    %c0_2 = arith.constant 0 : index
    %1 = vector.load %arg3[%c0_1, %c0_2] : memref<128x128xf32, #tpu.memory_space<vmem>>, vector<128x128xf32>
    %cst = arith.constant dense<0.000000e+00> : vector<8x128xf32>
    %2 = tpu.matmul %0, %1, %cst {dimension_numbers = #tpu.dot_dimension_numbers<[1], [0], [0], [1], [0, 0, 1, 1], [], []>} : vector<8x128xf32>, vector<128x128xf32>, vector<8x128xf32> -> vector<8x128xf32>
    %cst_3 = arith.constant 0.0441941731 : f32
    %3 = vector.broadcast %cst_3 : f32 to vector<8x128xf32>
    %4 = arith.mulf %2, %3 : vector<8x128xf32>
    %c0_4 = arith.constant 0 : index
    %c0_5 = arith.constant 0 : index
    %5 = vector.load %arg4[%c0_4, %c0_5] : memref<1x128xf32, #tpu.memory_space<vmem>>, vector<1x128xf32>
    %cst_6 = arith.constant 5.000000e-01 : f32
    %6 = vector.broadcast %cst_6 : f32 to vector<1x128xf32>
    %7 = arith.mulf %5, %6 : vector<1x128xf32>
    %8 = vector.broadcast %7 : vector<1x128xf32> to vector<8x128xf32>
    %9 = arith.addf %4, %8 : vector<8x128xf32>
    %c0_7 = arith.constant 0 : index
    %c0_8 = arith.constant 0 : index
    %10 = vector.load %arg5[%c0_7, %c0_8] : memref<8x128xf32, #tpu.memory_space<vmem>>, vector<8x128xf32>
    tpu.vector_store %arg5[%c0_7, %c0_8], %9 {strides = array<i32>} : memref<8x128xf32, #tpu.memory_space<vmem>>, vector<8x128xf32>,
    return
  }
  func.func @transform_0(%arg0: i32, %arg1: i32) -> (i32, i32) {
    %c0_i32 = arith.constant 0 : i32
    %c0_i32_0 = arith.constant 0 : i32
    return %arg0, %c0_i32 : i32, i32
  }
  func.func @transform_1(%arg0: i32, %arg1: i32) -> (i32, i32) {
    %c0_i32 = arith.constant 0 : i32
    %c0_i32_0 = arith.constant 0 : i32
    return %c0_i32, %arg1 : i32, i32
  }
  func.func @transform_2(%arg0: i32, %arg1: i32) -> (i32, i32) {
    %c0_i32 = arith.constant 0 : i32
    %c0_i32_0 = arith.constant 0 : i32
    return %c0_i32, %arg1 : i32, i32
  }
  func.func @transform_3(%arg0: i32, %arg1: i32) -> (i32, i32) {
    %c0_i32 = arith.constant 0 : i32
    return %arg0, %arg1 : i32, i32
  }
}

</mosaic_0001>

<bundles_post_ra>
// kernel: tpu_custom_call.1
= control target key start
LH: loop header
LB: loop body
LE: loop exit
PB: predicated region body
PF: predicated region fallthrough
CT: control target
= control target key end

     0   :  { %8 = vsyncpa [#allocation3], 0  ;;  %s1020_s0 = inlined_call_operand.hbm [shape: f32[16,128], index: 0, kind: input, shape index: {}]   ;;  %s1021_s1 = inlined_call_operand.hbm [shape: f32[128,128], index: 1, kind: input, shape index: {}]   ;;  %s1022_s2 = inlined_call_operand.vmem [shape: f32[1,128], index: 2, kind: input, shape index: {}]   ;;  %s1023_s3 = inlined_call_operand.hbm [shape: f32[16,128], index: 3, kind: output, shape index: {}]  }
   0x1   :  { %10 = vsyncpa [#allocation3 + $0x1], 0 }
   0x2   :  { %11 = vsyncpa [#allocation6], 0 }
   0x3   :  { %12 = vsyncpa [#allocation4], 0 }
   0x4   :  { %14 = vsyncpa [#allocation4 + $0x1], 0  ;;  %s796_s12 = smov 0   ;;  %s798_s13 = smov 0  }
   0x5   :  { %s800_s14 = smov 0   ;;  %s802_s15 = smov 0  }
   0x6   :  { %s804_s16 = smov 0   ;;  %s806_s17 = smov 0  }
   0x7 LB: > { %s452_s18 = sadd.s32 4294967295, %s766_s17   ;;  %s453_s19 = sadd.s32 4294967294, %s766_s17   ;;  %s766_s17 = sphi %s806_s17, %s20_s17   ;;  %s762_s16 = sphi %s804_s16, %s1047_s16   ;;  %s758_s15 = sphi %s802_s15, %s1046_s15   ;;  %s754_s14 = sphi %s800_s14, %s1045_s14   ;;  %s750_s13 = sphi %s798_s13, %s1044_s13   ;;  %s746_s12 = sphi %s796_s12, %s1043_s12  }
   0x8   : > { %p52_p0 = scmp.ne.s32.totalorder %s750_s13, %s746_s12  ;;  %p830_p1 = scmp.eq.s32.totalorder %s452_s18, 0 }
   0x9   : > { %p834_p2 = scmp.eq.s32.totalorder %s452_s18, 1  ;;  %p136_p3 = scmp.eq.s32.totalorder %s453_s19, 1 }
   0xa   : > { %s1028_s20 = scalar_select %p830_p1, 1, 0 }
   0xb   : > { %s1029_s21 = scalar_select %p834_p2, 1, 0 }
   0xc   : > { %p840_p4 = por %p830_p1, %p52_p0  ;;  %p454_p5 = scmp.ge.s32.totalorder %s766_s17, 1 }
   0xd   : > { %p845_p6 = por %p136_p3, %p52_p0  ;;  %p143_p7 = scmp.lt.s32.totalorder %s766_s17, 3 }
   0xe   : > { %s1030_s22 = scalar_select %p840_p4, 1, 0 }
   0xf   : > { %s1031_s23 = scalar_select %p845_p6, 1, 0 }
  0x10   : > { %p850_p8 = pnand %p454_p5, %p143_p7  ;;  %s768_s25 = smov [#allocation5]  }
  0x11   : > { %s157_s26 = sshll.u32 %s768_s25, 4  ;;  %s32_s28 = sadd.s32 1, %s762_s16  ;;  %s158_s26 = int_to_ptr.vmem [resolvable:$true] %s157_s26 }
  0x12   : > { %s1032_s24 = scalar_select %p850_p8, 1, 0 }
  0x13   : > { %p552_p9 = pneg %p850_p8  ;;  %s622_s4 = scalar_lea.hbm %s1021_s1, 2048 }
  0x14   : > { %p623_p12 = scmp.ne.s32.totalorder %s1021_s1, %s622_s4  ;;  %p629_p5 = scmp.lt.u32.totalorder %s622_s4, %s1021_s1 }
  0x15   : > { %p859_p11 = pnand %p552_p9, %p830_p1 }
  0x17   : > { %p624_p13 = pneg %p859_p11 }
  0x19   : > { %p625_p0 = pnand %p624_p13, %p623_p12 }
  0x1b   : > { %p626_p3 = pneg %p625_p0 }
  0x1d   : > { %p631_p7 = pnand %p629_p5, %p626_p3 }
  0x1f   : > { %634 = shalt.err (!%p631_p7)
}
  0x20   : > { %s635_s9 = scalar_lea.vmem %s158_s26, 2048  ;;  %p643_p1 = scmp.lt.s32.totalorder %s158_s26, %s158_s26 }
  0x21   : > { %p636_p9 = scmp.ne.s32.totalorder %s158_s26, %s635_s9  ;;  %p644_p4 = scmp.lt.s32.totalorder %s635_s9, %s635_s9 }
  0x23   : > { %p638_p10 = pnand %p636_p9, %p624_p13  ;;  %p645_p8 = por %p644_p4, %p643_p1 }
  0x25   : > { %p639_p6 = pneg %p638_p10 }
  0x27   : > { %p646_p2 = pnand %p645_p8, %p639_p6 }
  0x29   : > { %649 = shalt.err (!%p646_p2)
}
  0x2a   : > { %s769_s10 = smov 128   ;;  %s770_s11 = smov 8  }
  0x2b   : > { %555 = dma.hbm_to_vmem [thread:$0]  (!%p859_p11), %s1021_s1, 2048, %s158_s26, [#allocation6], %s769_s10, %s769_s10, %s770_s11  }
  0x2c   : > { %p34_p1 = scmp.ge.s32.totalorder %s32_s28, 2  ;;  %s39_s25 = sadd.s32 1, %s754_s14 }
  0x2d   : > { %p46_p2 = scmp.ne.s32.totalorder %s754_s14, %s750_s13  ;;  %p47_p4 = scmp.eq.s32.totalorder %s766_s17, 0 }
  0x2e   : > { %s1049_s28 = smov (%p34_p1, %s32_s28), 0  ;;  %p1035_p8 = scmp.ne.s32.totalorder %s1029_s21, 0 }
  0x2f   : > { %p886_p6 = por %p47_p4, %p46_p2  ;;  %s36_s27 = ssub.s32 %s762_s16, %s1049_s28 }
  0x30   : > { %p892_p10 = por %p1035_p8, %p46_p2  ;;  %p565_p12 = scmp.lt.s32.totalorder %s766_s17, 2 }
  0x31   : > { %p37_p11 = scmp.eq.s32.totalorder %s36_s27, 0  ;;  %s177_s26 = sand.u32 1, %s754_s14  }
  0x32   : > { %s458_s4 = sshll.u32 %s177_s26, 3  ;;  %s459_s6 = sshll.u32 %s762_s16, 7 }
  0x33   : > { %s901_s5 = scalar_select %p37_p11, %s754_s14, %s39_s25  }
  0x34   : > { %s907_s9 = scalar_lea.hbm %s1020_s0, %s459_s6  ;;  %s181_s21 = scalar_lea.vmem [#allocation2], %s458_s4 }
  0x35   : > { %s188_s10 = sshll.u32 %s181_s21, 4  ;;  %p913_p13 = pnand %p565_p12, %p886_p6  ;;  %s909_s10 = int_to_ptr.vmem [resolvable:$true] %s188_s10 }
  0x36   : > { %s178_s18 = scalar_lea.sflag [#allocation3], %s177_s26  ;;  %s650_s19 = scalar_lea.hbm %s907_s9, 128 }
  0x37   : > { %p651_p0 = scmp.ne.s32.totalorder %s907_s9, %s650_s19  ;;  %p652_p3 = pneg %p913_p13 }
  0x38   : > { %s655_s4 = scalar_lea.hbm %s1020_s0, 256  ;;  %p656_p9 = scmp.lt.u32.totalorder %s907_s9, %s1020_s0 }
  0x39   : > { %p653_p5 = pnand %p652_p3, %p651_p0  ;;  %p657_p1 = scmp.lt.u32.totalorder %s655_s4, %s650_s19 }
  0x3a   : > { %p659_p4 = scmp.lt.u32.totalorder %s650_s19, %s907_s9 }
  0x3b   : > { %p654_p7 = pneg %p653_p5  ;;  %p658_p2 = por %p657_p1, %p656_p9 }
  0x3d   : > { %p660_p6 = por %p659_p4, %p658_p2 }
  0x3f   : > { %p661_p8 = pnand %p660_p6, %p654_p7 }
  0x41   : > { %664 = shalt.err (!%p661_p8)
}
  0x42   : > { %s665_s26 = scalar_lea.vmem %s909_s10, 128  ;;  %s771_s7 = smov [#allocation2]  }
  0x43   : > { %p666_p12 = scmp.ne.s32.totalorder %s909_s10, %s665_s26  ;;  %s670_s8 = sshll.u32 %s771_s7, 4  ;;  %s671_s8 = int_to_ptr.vmem [resolvable:$false] %s670_s8 }
  0x44   : > { %s672_s21 = scalar_lea.vmem %s671_s8, 256  ;;  %p673_p5 = scmp.lt.s32.totalorder %s909_s10, %s671_s8 }
  0x45   : > { %p668_p11 = pnand %p666_p12, %p652_p3  ;;  %p674_p9 = scmp.lt.s32.totalorder %s672_s21, %s665_s26 }
  0x47   : > { %p669_p0 = pneg %p668_p11  ;;  %p675_p1 = por %p674_p9, %p673_p5 }
  0x49   : > { %p676_p2 = pnand %p675_p1, %p669_p0 }
  0x4b   : > { %679 = shalt.err (!%p676_p2)
}
  0x4c   : > { %559 = dma.hbm_to_vmem [thread:$0]  (!%p913_p13), %s907_s9, 128, %s909_s10, %s178_s18  }
  0x4d   : > { %p1038_p7 = scmp.ne.s32.totalorder %s1032_s24, 0 }
  0x4e   : > { %s945_s19 = sand.u32 (!%p1038_p7), 1, %s750_s13   ;;  %p1039_p3 = scmp.ne.s32.totalorder (!%p1038_p7), %s1030_s22, 0 }
  0x4f   : > { %197 = sbr.rel (%p1038_p7) target bundleno = 355 (0x163), region = 32  ;;  %s461_s25 = sshll.u32 (!%p1038_p7), %s945_s19, 3 }
  0x50   : > { %s200_s27 = scalar_lea.sflag (!%p1038_p7), [#allocation3], %s945_s19  ;;  %s951_s4 = scalar_lea.vmem (!%p1038_p7), [#allocation2], %s461_s25 }
  0x56   : > { %733 = dma.done.wait (%p1039_p3), %s200_s27, 128  }
  0x57   : > { %735 = vsyncadd (%p1039_p3), %s200_s27, 4294967168  ;;  %p1040_p13 = scmp.ne.s32.totalorder %s1028_s20, 0 }
  0x59   : > { %737 = dma.done.wait (%p1040_p13), [#allocation6], 2048  }
  0x5a   : > { %739 = vsyncadd (%p1040_p13), [#allocation6], 4294965248  ;;  %v772_v0 = vmov 0.0|0.0   ;;  %vm773_vm0 = vmmov 0   ;;  %v774_v1 = vmov 0.0   ;;  %v237_v2 = vld [vmem:[#allocation5] sm:$0xff]  ;;  %v327_v27 = vlaneseq }
  0x5b   : > { %520 = vmatprep.subr.bf16.mxu0 %v772_v0  ;;  %517 = vmatprep.mubr.msk.f32.mxu0 %vm773_vm0, %v774_v1  ;;  %v238_v3 = vld [vmem:[#allocation5 + $0x8] sm:$0xff]  ;;  %v239_v4 = vld [vmem:[#allocation5 + $0x10] sm:$0xff]  ;;  %v240_v6 = vld [vmem:[#allocation5 + $0x18] sm:$0xff]  ;;  %s465_s24 = sshll.u32 %s758_s15, 7  ;;  %s232_s9 = scalar_lea.vmem [#allocation7], %s461_s25 }
  0x5c   : > { %v521_v5 = vpack.c.bf16 %v238_v3, %v237_v2  ;;  %v524_v7 = vpack.c.bf16 %v240_v6, %v239_v4  ;;  %v241_v8 = vld [vmem:[#allocation5 + $0x20] sm:$0xff]  ;;  %v242_v9 = vld [vmem:[#allocation5 + $0x28] sm:$0xff]  ;;  %v243_v11 = vld [vmem:[#allocation5 + $0x30] sm:$0xff]  ;;  %v328_v28 = vshrl.u32 %v327_v27, 7  ;;  %s349_s10 = sshll.u32 %s232_s9, 4  ;;  %s971_s29 = scalar_lea.hbm %s1023_s3, %s465_s24  ;;  %s973_s10 = int_to_ptr.vmem [resolvable:$true] %s349_s10 }
  0x5d   : > { %v527_v10 = vpack.c.bf16 %v242_v9, %v241_v8  ;;  %v244_v12 = vld [vmem:[#allocation5 + $0x38] sm:$0xff]  ;;  %v245_v14 = vld [vmem:[#allocation5 + $0x40] sm:$0xff]  ;;  %v246_v15 = vld [vmem:[#allocation5 + $0x48] sm:$0xff]  ;;  %s335_s6 = scalar_lea.sflag [#allocation4], %s945_s19  ;;  %s680_s26 = scalar_lea.vmem %s973_s10, 128 }
  0x5e   : > { %522 = vmatpush3.bf16.msra.mxu0 %v521_v5  ;;  %v530_v13 = vpack.c.bf16 %v244_v12, %v243_v11  ;;  %v533_v16 = vpack.c.bf16 %v246_v15, %v245_v14  ;;  %v247_v17 = vld [vmem:[#allocation5 + $0x50] sm:$0xff]  ;;  %v248_v18 = vld [vmem:[#allocation5 + $0x58] sm:$0xff]  ;;  %v249_v20 = vld [vmem:[#allocation5 + $0x60] sm:$0xff]  ;;  %v329_v31 = vsub.s32 0, %v328_v28  ;;  %p681_p4 = scmp.ne.s32.totalorder %s973_s10, %s680_s26  ;;  %s775_s15 = smov [#allocation7]  }
  0x5f   : > { %523 = vmatprep.subr.bf16.mxu0 %v772_v0  ;;  %v536_v19 = vpack.c.bf16 %v248_v18, %v247_v17  ;;  %v250_v21 = vld [vmem:[#allocation5 + $0x68] sm:$0xff]  ;;  %v251_v23 = vld [vmem:[#allocation5 + $0x70] sm:$0xff]  ;;  %v252_v24 = vld [vmem:[#allocation5 + $0x78] sm:$0xff]  ;;  %s684_s7 = sshll.u32 %s775_s15, 4  ;;  %s685_s7 = int_to_ptr.vmem [resolvable:$false] %s684_s7 }
  0x60   : > { %v539_v22 = vpack.c.bf16 %v250_v21, %v249_v20  ;;  %v542_v25 = vpack.c.bf16 %v252_v24, %v251_v23  ;;  %v236_v26 = vld [vmem:[%s951_s4] sm:$0xff]  ;;  %p682_p6 = pnand %p681_p4, %p892_p10  ;;  %s686_s8 = scalar_lea.vmem %s685_s7, 256 }
  0x61   : > { %v324_v29 = vld [vmem:[%s1022_s2] sm:$0x1]  ;;  %p687_p12 = scmp.lt.s32.totalorder %s973_s10, %s685_s7  ;;  %p688_p11 = scmp.lt.s32.totalorder %s686_s8, %s680_s26 }
  0x62   : > { %525 = vmatpush3.bf16.msra.mxu0 %v524_v7  ;;  %v325_v30 = vmul.f32 0.5, %v324_v29  ;;  %p683_p8 = pneg %p682_p6 }
  0x63   : > { %526 = vmatprep.subr.bf16.mxu0 %v772_v0  ;;  %p689_p0 = por %p688_p11, %p687_p12 }
  0x64   : > { %v330_v32 = vrot.slane %v325_v30, %v329_v31 }
  0x65   : > { %p690_p5 = pnand %p689_p0, %p683_p8 }
  0x66   : > { %528 = vmatpush3.bf16.msra.mxu0 %v527_v10 }
  0x67   : > { %529 = vmatprep.subr.bf16.mxu0 %v772_v0 }
  0x6a   : > { %531 = vmatpush3.bf16.msra.mxu0 %v530_v13 }
  0x6b   : > { %532 = vmatprep.subr.bf16.mxu0 %v772_v0 }
  0x6e   : > { %534 = vmatpush3.bf16.msra.mxu0 %v533_v16 }
  0x6f   : > { %535 = vmatprep.subr.bf16.mxu0 %v772_v0 }
  0x72   : > { %537 = vmatpush3.bf16.msra.mxu0 %v536_v19 }
  0x73   : > { %538 = vmatprep.subr.bf16.mxu0 %v772_v0 }
  0x76   : > { %540 = vmatpush3.bf16.msra.mxu0 %v539_v22 }
  0x77   : > { %541 = vmatprep.subr.bf16.mxu0 %v772_v0 }
  0x7a   : > { %543 = vmatpush3.bf16.msra.mxu0 %v542_v25 }
  0x7d   : > { %518 = vmatmul.mubr.f32.vlgmr.msra.gmra.mrb[0].mxu0 %v236_v26 }
 0x150   : > { %v319_v33 = vpop.f32.mrb[0].mxu0 }
 0x151   : > { %v323_v34 = vmul.f32 0.044194173, %v319_v33  ;;  %v519_v35 = vpop.f32.mrb[1].mxu0 }
 0x153   : > { %v332_v36 = vadd.f32 %v330_v32, %v323_v34 }
 0x155   : > { %333 = vst [vmem:[%s232_s9] sm:$0xff] %v332_v36 }
 0x156   : > { %693 = shalt.err (!%p690_p5)
}
 0x157   : > { %s694_s21 = scalar_lea.hbm %s971_s29, 128  ;;  %s698_s27 = scalar_lea.hbm %s1023_s3, 256 }
 0x158   : > { %p695_p9 = scmp.ne.s32.totalorder %s971_s29, %s694_s21  ;;  %p699_p7 = scmp.lt.u32.totalorder %s971_s29, %s1023_s3 }
 0x159   : > { %p700_p3 = scmp.lt.u32.totalorder %s698_s27, %s694_s21  ;;  %p702_p4 = scmp.lt.u32.totalorder %s694_s21, %s971_s29 }
 0x15a   : > { %p696_p1 = pnand %p695_p9, %p892_p10 }
 0x15b   : > { %p701_p13 = por %p700_p3, %p699_p7 }
 0x15c   : > { %p697_p2 = pneg %p696_p1 }
 0x15d   : > { %p703_p6 = por %p702_p4, %p701_p13 }
 0x15f   : > { %p704_p8 = pnand %p703_p6, %p697_p2 }
 0x161   : > { %707 = shalt.err (!%p704_p8)
}
 0x162   : > { %550 = dma.vmem_to_hbm [thread:$0]  (%p892_p10), %s973_s10, 128, %s971_s29, %s335_s6  }
 0x163 PF: > { %s361_s22 = sand.u32 1, %s746_s12   ;;  %p1041_p12 = scmp.ne.s32.totalorder %s1031_s23, 0 }
 0x164   : > { %p1042_p11 = scmp.ge.s32.totalorder %s766_s17, 2  ;;  %s362_s24 = scalar_lea.sflag [#allocation4], %s361_s22 }
 0x166   : > { %p561_p0 = pnand %p1042_p11, %p1041_p12 }
 0x168   : > { %741 = dma.done.wait (!%p561_p0), %s362_s24, 128  }
 0x169   : > { %743 = vsyncadd (!%p561_p0), %s362_s24, 4294967168  ;;  %s20_s17 = sadd.s32 1, %s766_s17   ;;  %s1043_s12 = smov %s750_s13 }
 0x16a   : > { %p17_p5 = scmp.ge.s32.totalorder %s20_s17, 4   ;;  %s1044_s13 = smov %s754_s14 }
 0x16b   : > { %s1045_s14 = smov %s901_s5  ;;  %s1046_s15 = smov %s762_s16 }
 0x16c   : > { %s1047_s16 = smov %s1049_s28  ;;  %19 = sbr.rel (!%p17_p5) target bundleno = 7 (0x7), region = 85 }
 0x173   :  { %367 = vsyncpa [#allocation3], 1 }
 0x174   :  { %369 = vsyncpa [#allocation3 + $0x1], 1 }
 0x175   :  { %370 = vsyncpa [#allocation6], 1 }
 0x176   :  { %371 = vsyncpa [#allocation4], 1 }
 0x177   :  { %373 = vsyncpa [#allocation4 + $0x1], 1 }

</bundles_post_ra>
